<compile_context>
chip_gen: v6e
topology: v6e:2x2x1
jax: 0.10.0
libtpu: 0.0.40
codegen_flags: <defaults>
</compile_context>

<pallas_src>
import jax
import jax.numpy as jnp
from jax.experimental import pallas as pl
from jax.experimental.pallas import tpu as pltpu

EPS = 1e-5


# ---------------------------------------------------------------------------
# Kernel: y = relu(x @ W1 + b1); y = relu(y @ W2 + b2); out = y @ W3 + b3
# Weights may be bf16 (MXU fast path); biases / epilogue / accumulation are f32.
# ---------------------------------------------------------------------------
def _head_kernel(x_ref, w1_ref, b1_ref, w2_ref, b2_ref, w3_ref, b3_ref, out_ref):
    cdtype = w1_ref.dtype

    x = x_ref[...].astype(cdtype)

    h = jnp.dot(x, w1_ref[...], preferred_element_type=jnp.float32)
    h = jnp.maximum(h + b1_ref[...], 0.0)

    h = jnp.dot(h.astype(cdtype), w2_ref[...], preferred_element_type=jnp.float32)
    h = jnp.maximum(h + b2_ref[...], 0.0)

    out = jnp.dot(h.astype(cdtype), w3_ref[...], preferred_element_type=jnp.float32)
    out_ref[...] = (out + b3_ref[...]).astype(out_ref.dtype)


# ---------------------------------------------------------------------------
# BN folding (inference mode), done once in f32 in the wrapper.
# ---------------------------------------------------------------------------
def _fold_bn_into_linear(p):
    s0 = p["g0"] * jax.lax.rsqrt(p["v0"] + EPS)
    t0 = p["b0"] - p["m0"] * s0
    s1 = p["g1"] * jax.lax.rsqrt(p["v1"] + EPS)
    t1 = p["b1"] - p["m1"] * s1
    s2 = p["g2"] * jax.lax.rsqrt(p["v2"] + EPS)
    t2 = p["b2"] - p["m2"] * s2

    # norm (input BN) folds into the rows of W1; norm_1 folds into its columns/bias.
    w1 = p["w1"] * s0.reshape(-1, 1)
    b1 = t0 @ p["w1"] + p["bias1"]
    w1 = w1 * s1
    b1 = b1 * s1 + t1

    # norm_2 folds into the columns/bias of W2.
    w2 = p["w2"] * s2
    b2 = p["bias2"] * s2 + t2

    return w1, b1, w2, b2, p["w3"], p["bias3"]


# ---------------------------------------------------------------------------
# Wrapper: batch-tiled pipelined pallas_call.
# ---------------------------------------------------------------------------
def classification_head(x, params, *, tb=512, compute_dtype=jnp.float32):
    """x: (B, out_size) float32. params: dict (see init_params). Returns (B, num_label) f32."""
    B, d_in = x.shape

    # Fold the three inference BatchNorms into the Linear weights/biases (f32).
    w1, b1, w2, b2, w3, b3 = _fold_bn_into_linear(params)
    num_label = w3.shape[1]

    # Keep the output lane-dense: pad num_label to a multiple of 128, slice after.
    nl_pad = (-num_label) % 128
    if nl_pad:
        w3 = jnp.pad(w3, ((0, 0), (0, nl_pad)))
        b3 = jnp.pad(b3, ((0, 0), (0, nl_pad)))
    n_out = num_label + nl_pad

    # Cast weights for the MXU after the f32 fold; biases stay f32.
    w1c = w1.astype(compute_dtype)
    w2c = w2.astype(compute_dtype)
    w3c = w3.astype(compute_dtype)

    # Batch tile: multiple of 8 sublanes, no larger than (padded) B; pad B to a tile multiple.
    b8 = pl.cdiv(B, 8) * 8
    tb = max(8, min(int(tb), b8))
    tb = pl.cdiv(tb, 8) * 8
    b_pad = pl.cdiv(B, tb) * tb
    if b_pad != B:
        x = jnp.pad(x, ((0, b_pad - B), (0, 0)))
    grid = (b_pad // tb,)

    in_specs = [
        pl.BlockSpec((tb, d_in), lambda i: (i, 0)),   # activation tile, streamed
        pl.BlockSpec(w1c.shape, lambda i: (0, 0)),    # weights resident in VMEM
        pl.BlockSpec(b1.shape, lambda i: (0, 0)),
        pl.BlockSpec(w2c.shape, lambda i: (0, 0)),
        pl.BlockSpec(b2.shape, lambda i: (0, 0)),
        pl.BlockSpec(w3c.shape, lambda i: (0, 0)),
        pl.BlockSpec(b3.shape, lambda i: (0, 0)),
    ]
    out_specs = pl.BlockSpec((tb, n_out), lambda i: (i, 0))

    out = pl.pallas_call(
        _head_kernel,
        out_shape=jax.ShapeDtypeStruct((b_pad, n_out), jnp.float32),
        grid=grid,
        in_specs=in_specs,
        out_specs=out_specs,
        compiler_params=pltpu.CompilerParams(
            dimension_semantics=("parallel",),
        ),
    )(x, w1c, b1, w2c, b2, w3c, b3)

    return out[:B, :num_label]


# ---------------------------------------------------------------------------
# Deterministic synthetic parameters.  Linear weights stored as (in, out).
# ---------------------------------------------------------------------------
def init_params(key, out_size, h1, h2, num_label):
    ks = jax.random.split(key, 12)
    p = {}
    # BatchNorm1d(out_size)
    p["g0"] = 1.0 + 0.1 * jax.random.normal(ks[0], (1, out_size), jnp.float32)
    p["b0"] = 0.1 * jax.random.normal(ks[1], (1, out_size), jnp.float32)
    p["m0"] = 0.05 * jax.random.normal(ks[2], (1, out_size), jnp.float32)
    p["v0"] = jnp.abs(1.0 + 0.1 * jax.random.normal(ks[3], (1, out_size), jnp.float32))
    # Linear(out_size, h1)
    p["w1"] = jax.random.normal(ks[4], (out_size, h1), jnp.float32) / jnp.sqrt(out_size)
    p["bias1"] = 0.01 * jax.random.normal(ks[5], (1, h1), jnp.float32)
    # BatchNorm1d(h1)
    p["g1"] = jnp.ones((1, h1), jnp.float32)
    p["b1"] = jnp.zeros((1, h1), jnp.float32)
    p["m1"] = 0.05 * jax.random.normal(ks[6], (1, h1), jnp.float32)
    p["v1"] = jnp.abs(1.0 + 0.1 * jax.random.normal(ks[7], (1, h1), jnp.float32))
    # Linear(h1, h2)
    p["w2"] = jax.random.normal(ks[8], (h1, h2), jnp.float32) / jnp.sqrt(h1)
    p["bias2"] = 0.01 * jax.random.normal(ks[9], (1, h2), jnp.float32)
    # BatchNorm1d(h2)
    p["g2"] = jnp.ones((1, h2), jnp.float32)
    p["b2"] = jnp.zeros((1, h2), jnp.float32)
    p["m2"] = jnp.zeros((1, h2), jnp.float32)
    p["v2"] = jnp.ones((1, h2), jnp.float32)
    # Linear(h2, num_label)
    p["w3"] = jax.random.normal(ks[10], (h2, num_label), jnp.float32) / jnp.sqrt(h2)
    p["bias3"] = 0.01 * jax.random.normal(ks[11], (1, num_label), jnp.float32)
    return p


# ---------------------------------------------------------------------------
# Pure-JAX reference (un-folded, inference-mode BN) for validation.
# ---------------------------------------------------------------------------
def _bn(x, gamma, beta, mean, var):
    scale = gamma * jax.lax.rsqrt(var + EPS)
    shift = beta - mean * scale
    return x * scale + shift


def reference(x, p):
    h = _bn(x, p["g0"], p["b0"], p["m0"], p["v0"])
    h = h @ p["w1"] + p["bias1"]
    h = jnp.maximum(_bn(h, p["g1"], p["b1"], p["m1"], p["v1"]), 0.0)
    h = h @ p["w2"] + p["bias2"]
    h = jnp.maximum(_bn(h, p["g2"], p["b2"], p["m2"], p["v2"]), 0.0)
    return h @ p["w3"] + p["bias3"]


if __name__ == "__main__":
    # Small shapes consistent with the module (out_size -> h1 -> h2 -> num_label).
    B, OUT_SIZE, H1, H2, NUM_LABEL = 32, 128, 256, 128, 128

    key = jax.random.PRNGKey(0)
    kx, kp = jax.random.split(key)
    x = jax.random.normal(kx, (B, OUT_SIZE), jnp.float32)
    params = init_params(kp, OUT_SIZE, H1, H2, NUM_LABEL)

    ref = reference(x, params)

    # f32 path with a small batch tile so the pipelined grid (4 steps) is exercised.
    out_f32 = jax.block_until_ready(classification_head(x, params, tb=8))
    assert out_f32.shape == (B, NUM_LABEL)
    assert jnp.allclose(out_f32, ref, atol=1e-3, rtol=1e-3), "f32 mismatch vs reference"

    # bf16 weights/activations with f32 accumulation (v6e/v7x MXU fast path).
    out_bf16 = jax.block_until_ready(
        classification_head(x, params, tb=512, compute_dtype=jnp.bfloat16)
    )
    assert out_bf16.shape == (B, NUM_LABEL)
    assert jnp.allclose(out_bf16, ref, atol=5e-2, rtol=5e-2), "bf16 mismatch vs reference"

    print("KERNEL_OK")
</pallas_src>

<mosaic_0001>
module attributes {stable_mosaic.version = 11 : i64} {
  func.func @_head_kernel(%arg0: i32, %arg1: memref<8x128xf32, #tpu.memory_space<vmem>>, %arg2: memref<128x256xf32, #tpu.memory_space<vmem>>, %arg3: memref<1x256xf32, #tpu.memory_space<vmem>>, %arg4: memref<256x128xf32, #tpu.memory_space<vmem>>, %arg5: memref<1x128xf32, #tpu.memory_space<vmem>>, %arg6: memref<128x128xf32, #tpu.memory_space<vmem>>, %arg7: memref<1x128xf32, #tpu.memory_space<vmem>>, %arg8: memref<8x128xf32, #tpu.memory_space<vmem>>) attributes {dimension_semantics = [#tpu.dimension_semantics<parallel>], iteration_bounds = array<i64: 4>, scalar_prefetch = 0 : i64, scratch_operands = 0 : i64, tpu.core_type = #tpu.core_type<tc>, window_params = [{transform_indices = @transform_0, window_bounds = array<i64: 8, 128>}, {pipeline_mode = #tpu.pipeline_mode<synchronous>, transform_indices = @transform_1, window_bounds = array<i64: 128, 256>}, {pipeline_mode = #tpu.pipeline_mode<synchronous>, transform_indices = @transform_2, window_bounds = array<i64: 1, 256>}, {pipeline_mode = #tpu.pipeline_mode<synchronous>, transform_indices = @transform_3, window_bounds = array<i64: 256, 128>}, {pipeline_mode = #tpu.pipeline_mode<synchronous>, transform_indices = @transform_4, window_bounds = array<i64: 1, 128>}, {pipeline_mode = #tpu.pipeline_mode<synchronous>, transform_indices = @transform_5, window_bounds = array<i64: 128, 128>}, {pipeline_mode = #tpu.pipeline_mode<synchronous>, transform_indices = @transform_6, window_bounds = array<i64: 1, 128>}, {transform_indices = @transform_7, window_bounds = array<i64: 8, 128>}]} {
    %c0 = arith.constant 0 : index
    %c0_0 = arith.constant 0 : index
    %0 = vector.load %arg1[%c0, %c0_0] : memref<8x128xf32, #tpu.memory_space<vmem>>, vector<8x128xf32>
    %c0_1 = arith.constant 0 : index
    %c0_2 = arith.constant 0 : index
    %1 = vector.load %arg2[%c0_1, %c0_2] : memref<128x256xf32, #tpu.memory_space<vmem>>, vector<128x256xf32>
    %cst = arith.constant dense<0.000000e+00> : vector<8x256xf32>
    %2 = tpu.matmul %0, %1, %cst {dimension_numbers = #tpu.dot_dimension_numbers<[1], [0], [0], [1], [0, 0, 1, 1], [], []>} : vector<8x128xf32>, vector<128x256xf32>, vector<8x256xf32> -> vector<8x256xf32>
    %c0_3 = arith.constant 0 : index
    %c0_4 = arith.constant 0 : index
    %3 = vector.load %arg3[%c0_3, %c0_4] : memref<1x256xf32, #tpu.memory_space<vmem>>, vector<1x256xf32>
    %4 = vector.broadcast %3 : vector<1x256xf32> to vector<8x256xf32>
    %5 = arith.addf %2, %4 : vector<8x256xf32>
    %cst_5 = arith.constant 0.000000e+00 : f32
    %6 = vector.broadcast %cst_5 : f32 to vector<8x256xf32>
    %7 = arith.maximumf %5, %6 : vector<8x256xf32>
    %c0_6 = arith.constant 0 : index
    %c0_7 = arith.constant 0 : index
    %8 = vector.load %arg4[%c0_6, %c0_7] : memref<256x128xf32, #tpu.memory_space<vmem>>, vector<256x128xf32>
    %cst_8 = arith.constant dense<0.000000e+00> : vector<8x128xf32>
    %9 = tpu.matmul %7, %8, %cst_8 {dimension_numbers = #tpu.dot_dimension_numbers<[1], [0], [0], [1], [0, 0, 1, 1], [], []>} : vector<8x256xf32>, vector<256x128xf32>, vector<8x128xf32> -> vector<8x128xf32>
    %c0_9 = arith.constant 0 : index
    %c0_10 = arith.constant 0 : index
    %10 = vector.load %arg5[%c0_9, %c0_10] : memref<1x128xf32, #tpu.memory_space<vmem>>, vector<1x128xf32>
    %11 = vector.broadcast %10 : vector<1x128xf32> to vector<8x128xf32>
    %12 = arith.addf %9, %11 : vector<8x128xf32>
    %cst_11 = arith.constant 0.000000e+00 : f32
    %13 = vector.broadcast %cst_11 : f32 to vector<8x128xf32>
    %14 = arith.maximumf %12, %13 : vector<8x128xf32>
    %c0_12 = arith.constant 0 : index
    %c0_13 = arith.constant 0 : index
    %15 = vector.load %arg6[%c0_12, %c0_13] : memref<128x128xf32, #tpu.memory_space<vmem>>, vector<128x128xf32>
    %cst_14 = arith.constant dense<0.000000e+00> : vector<8x128xf32>
    %16 = tpu.matmul %14, %15, %cst_14 {dimension_numbers = #tpu.dot_dimension_numbers<[1], [0], [0], [1], [0, 0, 1, 1], [], []>} : vector<8x128xf32>, vector<128x128xf32>, vector<8x128xf32> -> vector<8x128xf32>
    %c0_15 = arith.constant 0 : index
    %c0_16 = arith.constant 0 : index
    %17 = vector.load %arg7[%c0_15, %c0_16] : memref<1x128xf32, #tpu.memory_space<vmem>>, vector<1x128xf32>
    %18 = vector.broadcast %17 : vector<1x128xf32> to vector<8x128xf32>
    %19 = arith.addf %16, %18 : vector<8x128xf32>
    %c0_17 = arith.constant 0 : index
    %c0_18 = arith.constant 0 : index
    %20 = vector.load %arg8[%c0_17, %c0_18] : memref<8x128xf32, #tpu.memory_space<vmem>>, vector<8x128xf32>
    tpu.vector_store %arg8[%c0_17, %c0_18], %19 {strides = array<i32>} : memref<8x128xf32, #tpu.memory_space<vmem>>, vector<8x128xf32>,
    return
  }
  func.func @transform_0(%arg0: i32) -> (i32, i32) {
    %c0_i32 = arith.constant 0 : i32
    %c0_i32_0 = arith.constant 0 : i32
    return %arg0, %c0_i32 : i32, i32
  }
  func.func @transform_1(%arg0: i32) -> (i32, i32) {
    %c0_i32 = arith.constant 0 : i32
    %c0_i32_0 = arith.constant 0 : i32
    %c0_i32_1 = arith.constant 0 : i32
    return %c0_i32, %c0_i32_0 : i32, i32
  }
  func.func @transform_2(%arg0: i32) -> (i32, i32) {
    %c0_i32 = arith.constant 0 : i32
    %c0_i32_0 = arith.constant 0 : i32
    %c0_i32_1 = arith.constant 0 : i32
    return %c0_i32, %c0_i32_0 : i32, i32
  }
  func.func @transform_3(%arg0: i32) -> (i32, i32) {
    %c0_i32 = arith.constant 0 : i32
    %c0_i32_0 = arith.constant 0 : i32
    %c0_i32_1 = arith.constant 0 : i32
    return %c0_i32, %c0_i32_0 : i32, i32
  }
  func.func @transform_4(%arg0: i32) -> (i32, i32) {
    %c0_i32 = arith.constant 0 : i32
    %c0_i32_0 = arith.constant 0 : i32
    %c0_i32_1 = arith.constant 0 : i32
    return %c0_i32, %c0_i32_0 : i32, i32
  }
  func.func @transform_5(%arg0: i32) -> (i32, i32) {
    %c0_i32 = arith.constant 0 : i32
    %c0_i32_0 = arith.constant 0 : i32
    %c0_i32_1 = arith.constant 0 : i32
    return %c0_i32, %c0_i32_0 : i32, i32
  }
  func.func @transform_6(%arg0: i32) -> (i32, i32) {
    %c0_i32 = arith.constant 0 : i32
    %c0_i32_0 = arith.constant 0 : i32
    %c0_i32_1 = arith.constant 0 : i32
    return %c0_i32, %c0_i32_0 : i32, i32
  }
  func.func @transform_7(%arg0: i32) -> (i32, i32) {
    %c0_i32 = arith.constant 0 : i32
    %c0_i32_0 = arith.constant 0 : i32
    return %arg0, %c0_i32 : i32, i32
  }
}

</mosaic_0001>

<bundles_post_ra>
// kernel: tpu_custom_call.1
= control target key start
LH: loop header
LB: loop body
LE: loop exit
PB: predicated region body
PF: predicated region fallthrough
CT: control target
= control target key end

     0   :  { %s1409_s0 = inlined_call_operand.hbm [shape: f32[32,128], index: 0, kind: input, shape index: {}]   ;;  %s1410_s1 = inlined_call_operand.hbm [shape: f32[128,256], index: 1, kind: input, shape index: {}]   ;;  %s1411_s2 = inlined_call_operand.vmem [shape: f32[1,256], index: 2, kind: input, shape index: {}]   ;;  %s1412_s3 = inlined_call_operand.hbm [shape: f32[256,128], index: 3, kind: input, shape index: {}]   ;;  %s1413_s4 = inlined_call_operand.vmem [shape: f32[1,128], index: 4, kind: input, shape index: {}]   ;;  %s1414_s5 = inlined_call_operand.hbm [shape: f32[128,128], index: 5, kind: input, shape index: {}]   ;;  %s1415_s6 = inlined_call_operand.vmem [shape: f32[1,128], index: 6, kind: input, shape index: {}]   ;;  %s1416_s7 = inlined_call_operand.hbm [shape: f32[32,128], index: 7, kind: output, shape index: {}]  }
   0x1   :  { %1421 = sst [smem:[#allocation15_spill]] %s1410_s1 }
   0x2   :  { %1422 = sst [smem:[#allocation16_spill]] %s1412_s3 }
   0x3   :  { %12 = vsyncpa [#allocation3], 0 }
   0x4   :  { %14 = vsyncpa [#allocation3 + $0x1], 0 }
   0x5   :  { %15 = vsyncpa [#allocation6], 0 }
   0x6   :  { %16 = vsyncpa [#allocation9], 0 }
   0x7   :  { %17 = vsyncpa [#allocation4], 0 }
   0x8   :  { %19 = vsyncpa [#allocation4 + $0x1], 0  ;;  %s1194_s24 = smov 0   ;;  %s1196_s25 = smov 0  }
   0x9   :  { %s1198_s26 = smov 0   ;;  %s1200_s27 = smov 0  }
   0xa LB: > { %s1215_s28 = sadd.s32 4294967295, %s1141_s27   ;;  %s773_s29 = sadd.s32 4294967294, %s1141_s27   ;;  %s1141_s27 = sphi %s1200_s27, %s1443_s27   ;;  %s1137_s26 = sphi %s1198_s26, %s1442_s26   ;;  %s1133_s25 = sphi %s1196_s25, %s1441_s25   ;;  %s1129_s24 = sphi %s1194_s24, %s1440_s24  }
   0xb   : > { %p45_p0 = scmp.ne.s32.totalorder %s1133_s25, %s1129_s24  ;;  %p1417_p1 = scmp.eq.s32.totalorder %s1215_s28, 0 }
   0xc   : > { %p201_p3 = scmp.eq.s32.totalorder %s773_s29, 3  ;;  %p774_p5 = scmp.ge.s32.totalorder %s1141_s27, 1 }
   0xd   : > { %p1224_p4 = por %p1417_p1, %p45_p0  ;;  %p208_p7 = scmp.lt.s32.totalorder %s1141_s27, 5 }
   0xe   : > { %p1229_p6 = por %p201_p3, %p45_p0  ;;  %s1143_s10 = smov [#allocation5]  }
   0xf   : > { %s1423_s30 = scalar_select %p1224_p4, 1, 0 }
  0x10   : > { %s1424_s8 = scalar_select %p1229_p6, 1, 0 }
  0x11   : > { %p1234_p8 = pnand %p774_p5, %p208_p7  ;;  %s220_s11 = sshll.u32 %s1143_s10, 4  ;;  %s221_s11 = int_to_ptr.vmem [resolvable:$true] %s220_s11 }
  0x12   : > { %s1144_s13 = smov [#allocation7]   ;;  %s974_s15 = scalar_lea.vmem %s221_s11, 4096 }
  0x13   : > { %s1425_s9 = scalar_select %p1234_p8, 1, 0 }
  0x14   : > { %p896_p9 = pneg %p1234_p8  ;;  %s236_s14 = sshll.u32 %s1144_s13, 4  ;;  %s237_s14 = int_to_ptr.vmem [resolvable:$true] %s236_s14 }
  0x15   : > { %p975_p12 = scmp.ne.s32.totalorder %s221_s11, %s974_s15  ;;  %p982_p3 = scmp.lt.s32.totalorder %s221_s11, %s221_s11 }
  0x16   : > { %p1242_p10 = pnand %p896_p9, %p1417_p1  ;;  %p983_p5 = scmp.lt.s32.totalorder %s974_s15, %s974_s15 }
  0x18   : > { %p965_p11 = pneg %p1242_p10  ;;  %p984_p7 = por %p983_p5, %p982_p3 }
  0x1a   : > { %p977_p13 = pnand %p975_p12, %p965_p11 }
  0x1c   : > { %p978_p0 = pneg %p977_p13 }
  0x1e   : > { %p985_p9 = pnand %p984_p7, %p978_p0 }
  0x20   : > { %988 = shalt.err (!%p985_p9)
}
  0x21   : > { %s1145_s16 = smov 256   ;;  %s1146_s17 = smov 16  }
  0x22   : > { %s1427_s1 = sld [smem:[#allocation15_spill]]  ;;  %s1000_s20 = scalar_lea.vmem %s237_s14, 4096 }
  0x23   : > { %p1001_p1 = scmp.ne.s32.totalorder %s237_s14, %s1000_s20  ;;  %p1008_p2 = scmp.lt.s32.totalorder %s237_s14, %s237_s14 }
  0x24   : > { %p1009_p6 = scmp.lt.s32.totalorder %s1000_s20, %s1000_s20 }
  0x25   : > { %p1003_p12 = pnand %p1001_p1, %p965_p11 }
  0x26   : > { %p1010_p3 = por %p1009_p6, %p1008_p2 }
  0x27   : > { %p1004_p13 = pneg %p1003_p12 }
  0x28   : > { %899 = dma.hbm_to_vmem [thread:$0]  (!%p1242_p10), %s1427_s1, 4096, %s221_s11, [#allocation6], %s1145_s16, %s1145_s16, %s1146_s17  }
  0x29   : > { %p1011_p0 = pnand %p1010_p3, %p1004_p13 }
  0x2b   : > { %1014 = shalt.err (!%p1011_p0)
}
  0x2c   : > { %s1147_s21 = smov 128   ;;  %s1148_s22 = smov 8  }
  0x2d   : > { %s1428_s3 = sld [smem:[#allocation16_spill]]  ;;  %s1149_s10 = smov [#allocation8]  }
  0x2e   : > { %s252_s11 = sshll.u32 %s1149_s10, 4  ;;  %s1265_s13 = sadd.s32 1, %s1141_s27   ;;  %s253_s11 = int_to_ptr.vmem [resolvable:$true] %s252_s11 }
  0x2f   : > { %s1026_s15 = scalar_lea.vmem %s253_s11, 2048  ;;  %p1034_p5 = scmp.lt.s32.totalorder %s253_s11, %s253_s11 }
  0x30   : > { %p1027_p1 = scmp.ne.s32.totalorder %s253_s11, %s1026_s15  ;;  %p1035_p7 = scmp.lt.s32.totalorder %s1026_s15, %s1026_s15 }
  0x32   : > { %p1029_p2 = pnand %p1027_p1, %p965_p11  ;;  %p1036_p9 = por %p1035_p7, %p1034_p5 }
  0x33   : > { %902 = dma.hbm_to_vmem [thread:$0]  (!%p1242_p10), %s1428_s3, 4096, %s237_s14, [#allocation6], %s1147_s21, %s1147_s21, %s1148_s22  }
  0x34   : > { %p1030_p6 = pneg %p1029_p2 }
  0x36   : > { %p1037_p12 = pnand %p1036_p9, %p1030_p6 }
  0x38   : > { %1040 = shalt.err (!%p1037_p12)
}
  0x39   : > { %905 = dma.hbm_to_vmem [thread:$0]  (!%p1242_p10), %s1414_s5, 2048, %s253_s11, [#allocation9], %s1147_s21, %s1147_s21, %s1148_s22  }
  0x3a   : > { %s29_s17 = ssub.s32 %s1141_s27, %s1265_s13  ;;  %s32_s18 = sadd.s32 1, %s1137_s26 }
  0x3b   : > { %p30_p11 = scmp.eq.s32.totalorder %s29_s17, 0  ;;  %p39_p13 = scmp.ne.s32.totalorder %s1137_s26, %s1133_s25 }
  0x3c   : > { %p40_p3 = scmp.eq.s32.totalorder %s1141_s27, 0  ;;  %p917_p0 = scmp.lt.s32.totalorder %s1141_s27, 4 }
  0x3d   : > { %s1283_s12 = scalar_select %p30_p11, %s1137_s26, %s32_s18  }
  0x3e   : > { %p41_p1 = por %p40_p3, %p39_p13  ;;  %p1429_p2 = scmp.eq.s32.totalorder %s1215_s28, 3 }
  0x3f   : > { %s269_s20 = sand.u32 1, %s1137_s26   ;;  %s780_s23 = sshll.u32 %s1141_s27, 7 }
  0x40   : > { %p1287_p6 = por %p1429_p2, %p39_p13  ;;  %s779_s29 = sshll.u32 %s269_s20, 3 }
  0x41   : > { %s1296_s21 = scalar_lea.hbm %s1409_s0, %s780_s23  ;;  %s273_s22 = scalar_lea.vmem [#allocation2], %s779_s29 }
  0x42   : > { %s1430_s19 = scalar_select %p1287_p6, 1, 0 }
  0x43   : > { %s280_s11 = sshll.u32 %s273_s22, 4  ;;  %p1298_p10 = pnand %p917_p0, %p41_p1  ;;  %s281_s11 = int_to_ptr.vmem [resolvable:$true] %s280_s11 }
  0x44   : > { %s270_s14 = scalar_lea.sflag [#allocation3], %s269_s20  ;;  %s1041_s17 = scalar_lea.hbm %s1296_s21, 128 }
  0x45   : > { %p1042_p5 = scmp.ne.s32.totalorder %s1296_s21, %s1041_s17  ;;  %p1043_p7 = pneg %p1298_p10 }
  0x46   : > { %s1046_s10 = scalar_lea.hbm %s1409_s0, 512  ;;  %p1047_p11 = scmp.lt.s32.totalorder %s1296_s21, %s1409_s0 }
  0x47   : > { %p1044_p9 = pnand %p1043_p7, %p1042_p5  ;;  %p1048_p13 = scmp.lt.s32.totalorder %s1046_s10, %s1041_s17 }
  0x49   : > { %p1045_p12 = pneg %p1044_p9  ;;  %p1049_p3 = por %p1048_p13, %p1047_p11 }
  0x4b   : > { %p1050_p0 = pnand %p1049_p3, %p1045_p12 }
  0x4d   : > { %1053 = shalt.err (!%p1050_p0)
}
  0x4e   : > { %s1054_s22 = scalar_lea.vmem %s281_s11, 128  ;;  %s1150_s20 = smov [#allocation2]  }
  0x4f   : > { %p1055_p1 = scmp.ne.s32.totalorder %s281_s11, %s1054_s22  ;;  %s1059_s1 = sshll.u32 %s1150_s20, 4  ;;  %s1060_s1 = int_to_ptr.vmem [resolvable:$false] %s1059_s1 }
  0x50   : > { %s1061_s3 = scalar_lea.vmem %s1060_s1, 256  ;;  %p1062_p5 = scmp.lt.s32.totalorder %s281_s11, %s1060_s1 }
  0x51   : > { %p1057_p2 = pnand %p1055_p1, %p1043_p7  ;;  %p1063_p9 = scmp.lt.s32.totalorder %s1061_s3, %s1054_s22 }
  0x53   : > { %p1058_p6 = pneg %p1057_p2  ;;  %p1064_p4 = por %p1063_p9, %p1062_p5 }
  0x55   : > { %p1065_p8 = pnand %p1064_p4, %p1058_p6 }
  0x57   : > { %1068 = shalt.err (!%p1065_p8)
}
  0x58   : > { %909 = dma.hbm_to_vmem [thread:$0]  (!%p1298_p10), %s1296_s21, 128, %s281_s11, %s270_s14  }
  0x59   : > { %p1432_p12 = scmp.ne.s32.totalorder %s1425_s9, 0 }
  0x5a   : > { %s1319_s17 = sand.u32 (!%p1432_p12), 1, %s1133_s25   ;;  %p1433_p4 = scmp.ne.s32.totalorder (!%p1432_p12), %s1423_s30, 0 }
  0x5b   : > { %289 = sbr.rel (%p1432_p12) target bundleno = 746 (0x2ea), region = 48  ;;  %s782_s18 = sshll.u32 (!%p1432_p12), %s1319_s17, 3 }
  0x5c   : > { %s292_s1 = scalar_lea.sflag (!%p1432_p12), [#allocation3], %s1319_s17  ;;  %s1325_s3 = scalar_lea.vmem (!%p1432_p12), [#allocation2], %s782_s18 }
  0x60   : > { %1112 = dma.done.wait (%p1433_p4), %s292_s1, 128  }
  0x61   : > { %1114 = vsyncadd (%p1433_p4), %s292_s1, 4294967168  ;;  %p1434_p8 = scmp.eq.s32.totalorder %s1215_s28, 0 }
  0x63   : > { %1116 = dma.done.wait (%p1434_p8), [#allocation6], 8192   ;;  %p1435_p6 = pmov %p1434_p8 }
  0x65   : > { %1118 = vsyncadd (%p1435_p6), [#allocation6], 4294959104  ;;  %p1436_p10 = pmov %p1435_p6 }
  0x66   : > { %p1437_p7 = pmov %p1435_p6 }
  0x67   : > { %1120 = dma.done.wait (%p1436_p10), [#allocation9], 2048  }
  0x68   : > { %1122 = vsyncadd (%p1437_p7), [#allocation9], 4294965248  ;;  %v1151_v0 = vmov 0.0   ;;  %v370_v1 = vld [vmem:[#allocation5 + $0xf8] sm:$0xff]  ;;  %v369_v2 = vld [vmem:[#allocation5 + $0xf0] sm:$0xff]  ;;  %vm1152_vm0 = vmmov 0  }
  0x69   : > { %447 = vmatprep.mubr.f32.mxu0 %v1151_v0  ;;  %v368_v3 = vld [vmem:[#allocation5 + $0xe8] sm:$0xff]  ;;  %383 = vmatprep.subr.mxu0 %v370_v1  ;;  %v367_v4 = vld [vmem:[#allocation5 + $0xe0] sm:$0xff]  ;;  %v366_v5 = vld [vmem:[#allocation5 + $0xd8] sm:$0xff]  ;;  %s790_s23 = sshll.u32 %s1215_s28, 7  ;;  %s337_s10 = scalar_lea.vmem [#allocation10], %s782_s18 }
  0x6a   : > { %384 = vmatpush1.msra.mxu0 %v369_v2  ;;  %v365_v6 = vld [vmem:[#allocation5 + $0xd0] sm:$0xff]  ;;  %v364_v7 = vld [vmem:[#allocation5 + $0xc8] sm:$0xff]  ;;  %v363_v8 = vld [vmem:[#allocation5 + $0xc0] sm:$0xff]  ;;  %s674_s15 = sshll.u32 %s337_s10, 4  ;;  %s1373_s20 = scalar_lea.hbm %s1416_s7, %s790_s23  ;;  %s675_s15 = int_to_ptr.vmem [resolvable:$true] %s674_s15 }
  0x6b   : > { %385 = vmatprep.subr.mxu0 %v368_v3  ;;  %v362_v9 = vld [vmem:[#allocation5 + $0xb8] sm:$0xff]  ;;  %v361_v10 = vld [vmem:[#allocation5 + $0xb0] sm:$0xff]  ;;  %v360_v11 = vld [vmem:[#allocation5 + $0xa8] sm:$0xff]  ;;  %s661_s1 = scalar_lea.sflag [#allocation4], %s1319_s17  ;;  %p1438_p13 = scmp.ne.s32.totalorder %s1430_s19, 0 }
  0x6c   : > { %386 = vmatpush1.msra.mxu0 %v367_v4  ;;  %v359_v12 = vld [vmem:[#allocation5 + $0xa0] sm:$0xff]  ;;  %v358_v13 = vld [vmem:[#allocation5 + $0x98] sm:$0xff]  ;;  %v357_v14 = vld [vmem:[#allocation5 + $0x90] sm:$0xff]  ;;  %s1153_s28 = smov [#allocation10]  }
  0x6d   : > { %387 = vmatprep.subr.mxu0 %v366_v5  ;;  %v487_v15 = vld [vmem:[#allocation7 + $0xf8] sm:$0xff]  ;;  %v486_v17 = vld [vmem:[#allocation7 + $0xf0] sm:$0xff]  ;;  %v356_v18 = vld [vmem:[#allocation5 + $0x88] sm:$0xff]  ;;  %s1073_s30 = sshll.u32 %s1153_s28, 4  ;;  %s1074_s30 = int_to_ptr.vmem [resolvable:$false] %s1073_s30 }
  0x6e   : > { %388 = vmatpush1.msra.mxu0 %v365_v6  ;;  %v471_v16 = vld [vmem:[#allocation7 + $0x78] sm:$0xff]  ;;  %793 = vmatprep.subr.mxu1 %v487_v15  ;;  %v470_v19 = vld [vmem:[#allocation7 + $0x70] sm:$0xff]  ;;  %v355_v20 = vld [vmem:[#allocation5 + $0x80] sm:$0xff]  ;;  %s1075_s18 = scalar_lea.vmem %s1074_s30, 256  ;;  %p1076_p1 = scmp.lt.s32.totalorder %s675_s15, %s1074_s30 }
  0x6f   : > { %389 = vmatprep.subr.mxu0 %v364_v7  ;;  %794 = vmatpush3.msra.mxu1 %v471_v16  ;;  %v485_v21 = vld [vmem:[#allocation7 + $0xe8] sm:$0xff]  ;;  %v354_v22 = vld [vmem:[#allocation5 + $0x78] sm:$0xff]  ;;  %v353_v24 = vld [vmem:[#allocation5 + $0x70] sm:$0xff] }
  0x70   : > { %390 = vmatpush1.msra.mxu0 %v363_v8  ;;  %795 = vmatprep.subr.mxu1 %v486_v17  ;;  %v469_v23 = vld [vmem:[#allocation7 + $0x68] sm:$0xff]  ;;  %v484_v25 = vld [vmem:[#allocation7 + $0xe0] sm:$0xff]  ;;  %v483_v29 = vld [vmem:[#allocation7 + $0xd8] sm:$0xff] }
  0x71   : > { %391 = vmatprep.subr.mxu0 %v362_v9  ;;  %796 = vmatpush3.msra.mxu1 %v470_v19  ;;  %v352_v26 = vld [vmem:[#allocation5 + $0x68] sm:$0xff]  ;;  %v468_v27 = vld [vmem:[#allocation7 + $0x60] sm:$0xff]  ;;  %v350_v30 = vld [vmem:[#allocation5 + $0x58] sm:$0xff] }
  0x72   : > { %392 = vmatpush1.msra.mxu0 %v361_v10  ;;  %797 = vmatprep.subr.mxu1 %v485_v21  ;;  %v351_v28 = vld [vmem:[#allocation5 + $0x60] sm:$0xff]  ;;  %v467_v31 = vld [vmem:[#allocation7 + $0x58] sm:$0xff]  ;;  %v349_v32 = vld [vmem:[#allocation5 + $0x50] sm:$0xff] }
  0x73   : > { %393 = vmatprep.subr.mxu0 %v360_v11  ;;  %798 = vmatpush3.msra.mxu1 %v469_v23  ;;  %v482_v33 = vld [vmem:[#allocation7 + $0xd0] sm:$0xff]  ;;  %v348_v34 = vld [vmem:[#allocation5 + $0x48] sm:$0xff]  ;;  %v347_v36 = vld [vmem:[#allocation5 + $0x40] sm:$0xff] }
  0x74   : > { %394 = vmatpush1.msra.mxu0 %v359_v12  ;;  %799 = vmatprep.subr.mxu1 %v484_v25  ;;  %v466_v35 = vld [vmem:[#allocation7 + $0x50] sm:$0xff]  ;;  %v481_v37 = vld [vmem:[#allocation7 + $0xc8] sm:$0xff]  ;;  %v346_v38 = vld [vmem:[#allocation5 + $0x38] sm:$0xff] }
  0x75   : > { %395 = vmatprep.subr.mxu0 %v358_v13  ;;  %800 = vmatpush3.msra.mxu1 %v468_v27  ;;  %v465_v39 = vld [vmem:[#allocation7 + $0x48] sm:$0xff]  ;;  %v345_v40 = vld [vmem:[#allocation5 + $0x30] sm:$0xff]  ;;  %v480_v41 = vld [vmem:[#allocation7 + $0xc0] sm:$0xff] }
  0x76   : > { %396 = vmatpush1.msra.mxu0 %v357_v14  ;;  %801 = vmatprep.subr.mxu1 %v483_v29  ;;  %v344_v42 = vld [vmem:[#allocation5 + $0x28] sm:$0xff]  ;;  %v464_v43 = vld [vmem:[#allocation7 + $0x40] sm:$0xff]  ;;  %v479_v45 = vld [vmem:[#allocation7 + $0xb8] sm:$0xff]  ;;  %v373_v14 = vlaneseq }
  0x77   : > { %397 = vmatprep.subr.mxu0 %v356_v18  ;;  %802 = vmatpush3.msra.mxu1 %v467_v31  ;;  %v343_v44 = vld [vmem:[#allocation5 + $0x20] sm:$0xff]  ;;  %v342_v46 = vld [vmem:[#allocation5 + $0x18] sm:$0xff]  ;;  %v341_v48 = vld [vmem:[#allocation5 + $0x10] sm:$0xff] }
  0x78   : > { %398 = vmatpush1.msra.mxu0 %v355_v20  ;;  %803 = vmatprep.subr.mxu1 %v482_v33  ;;  %v463_v47 = vld [vmem:[#allocation7 + $0x38] sm:$0xff]  ;;  %v478_v49 = vld [vmem:[#allocation7 + $0xb0] sm:$0xff]  ;;  %v340_v50 = vld [vmem:[#allocation5 + $0x8] sm:$0xff]  ;;  %v374_v15 = vshrl.u32 %v373_v14, 7 }
  0x79   : > { %399 = vmatprep.subr.mxu0 %v354_v22  ;;  %804 = vmatpush3.msra.mxu1 %v466_v35  ;;  %v462_v51 = vld [vmem:[#allocation7 + $0x30] sm:$0xff]  ;;  %v339_v52 = vld [vmem:[#allocation5] sm:$0xff]  ;;  %v477_v53 = vld [vmem:[#allocation7 + $0xa8] sm:$0xff] }
  0x7a   : > { %400 = vmatpush1.msra.mxu0 %v353_v24  ;;  %805 = vmatprep.subr.mxu1 %v481_v37  ;;  %v338_v54 = vld [vmem:[%s1325_s3] sm:$0xff]  ;;  %v461_v55 = vld [vmem:[#allocation7 + $0x28] sm:$0xff]  ;;  %v476_v56 = vld [vmem:[#allocation7 + $0xa0] sm:$0xff]  ;;  %v375_v16 = vsub.s32 0, %v374_v15  ;;  %v379_v18 = vsub.s32 1, %v374_v15  ;;  %s1069_s3 = scalar_lea.vmem %s675_s15, 128 }
  0x7b   : > { %401 = vmatprep.subr.mxu0 %v352_v26  ;;  %806 = vmatpush3.msra.mxu1 %v465_v39  ;;  %v460_v57 = vld [vmem:[#allocation7 + $0x20] sm:$0xff]  ;;  %v475_v58 = vld [vmem:[#allocation7 + $0x98] sm:$0xff]  ;;  %v474_v60 = vld [vmem:[#allocation7 + $0x90] sm:$0xff]  ;;  %p1070_p11 = scmp.ne.s32.totalorder %s675_s15, %s1069_s3  ;;  %p1077_p2 = scmp.lt.s32.totalorder %s1075_s18, %s1069_s3 }
  0x7c   : > { %402 = vmatpush1.msra.mxu0 %v351_v28  ;;  %807 = vmatprep.subr.mxu1 %v480_v41  ;;  %v459_v59 = vld [vmem:[#allocation7 + $0x18] sm:$0xff]  ;;  %v458_v61 = vld [vmem:[#allocation7 + $0x10] sm:$0xff]  ;;  %v473_v62 = vld [vmem:[#allocation7 + $0x88] sm:$0xff] }
  0x7d   : > { %403 = vmatprep.subr.mxu0 %v350_v30  ;;  %808 = vmatpush3.msra.mxu1 %v464_v43  ;;  %v457_v63 = vld [vmem:[#allocation7 + $0x8] sm:$0xff]  ;;  %v472_v1 = vld [vmem:[#allocation7 + $0x80] sm:$0xff]  ;;  %v581_v3 = vld [vmem:[#allocation8 + $0x78] sm:$0xff]  ;;  %p1071_p3 = pnand %p1070_p11, %p1438_p13  ;;  %p1078_p5 = por %p1077_p2, %p1076_p1 }
  0x7e   : > { %404 = vmatpush1.msra.mxu0 %v349_v32  ;;  %809 = vmatprep.subr.mxu1 %v479_v45  ;;  %v456_v2 = vld [vmem:[#allocation7] sm:$0xff]  ;;  %v580_v4 = vld [vmem:[#allocation8 + $0x70] sm:$0xff]  ;;  %v579_v5 = vld [vmem:[#allocation8 + $0x68] sm:$0xff] }
  0x7f   : > { %405 = vmatprep.subr.mxu0 %v348_v34  ;;  %810 = vmatpush3.msra.mxu1 %v463_v47  ;;  %v578_v6 = vld [vmem:[#allocation8 + $0x60] sm:$0xff]  ;;  %v577_v7 = vld [vmem:[#allocation8 + $0x58] sm:$0xff]  ;;  %v576_v8 = vld [vmem:[#allocation8 + $0x50] sm:$0xff]  ;;  %p1072_p0 = pneg %p1071_p3 }
  0x80   : > { %406 = vmatpush1.msra.mxu0 %v347_v36  ;;  %811 = vmatprep.subr.mxu1 %v478_v49  ;;  %v575_v9 = vld [vmem:[#allocation8 + $0x48] sm:$0xff]  ;;  %v574_v10 = vld [vmem:[#allocation8 + $0x40] sm:$0xff]  ;;  %v573_v11 = vld [vmem:[#allocation8 + $0x38] sm:$0xff] }
  0x81   : > { %407 = vmatprep.subr.mxu0 %v346_v38  ;;  %812 = vmatpush3.msra.mxu1 %v462_v51  ;;  %v572_v12 = vld [vmem:[#allocation8 + $0x30] sm:$0xff]  ;;  %v571_v13 = vld [vmem:[#allocation8 + $0x28] sm:$0xff]  ;;  %v570_v27 = vld [vmem:[#allocation8 + $0x20] sm:$0xff]  ;;  %p1079_p9 = pnand %p1078_p5, %p1072_p0 }
  0x82   : > { %408 = vmatpush1.msra.mxu0 %v345_v40  ;;  %813 = vmatprep.subr.mxu1 %v477_v53  ;;  %v371_v17 = vld [vmem:[%s1411_s2] sm:$0x3]  ;;  %v569_v28 = vld [vmem:[#allocation8 + $0x18] sm:$0xff]  ;;  %v567_v30 = vld [vmem:[#allocation8 + $0x8] sm:$0xff] }
  0x83   : > { %409 = vmatprep.subr.mxu0 %v344_v42  ;;  %814 = vmatpush3.msra.mxu1 %v461_v55  ;;  %v376_v19 = vrot.slane %v371_v17, %v375_v16  ;;  %v380_v20 = vrot.slane %v371_v17, %v379_v18  ;;  %v568_v29 = vld [vmem:[#allocation8 + $0x10] sm:$0xff]  ;;  %v566_v31 = vld [vmem:[#allocation8] sm:$0xff] }
  0x84   : > { %410 = vmatpush1.msra.mxu0 %v343_v44  ;;  %815 = vmatprep.subr.mxu1 %v476_v56  ;;  %v787_v33 = vld [vmem:[%s1413_s4] ss:$0 sm:$0xff] }
  0x85   : > { %411 = vmatprep.subr.mxu0 %v342_v46  ;;  %816 = vmatpush3.msra.mxu1 %v460_v57  ;;  %v788_v38 = vld [vmem:[%s1415_s6] ss:$0 sm:$0xff] }
  0x86   : > { %412 = vmatpush1.msra.mxu0 %v341_v48  ;;  %817 = vmatprep.subr.mxu1 %v475_v58 }
  0x87   : > { %413 = vmatprep.subr.mxu0 %v340_v50  ;;  %818 = vmatpush3.msra.mxu1 %v459_v59 }
  0x88   : > { %414 = vmatpush1.msra.mxu0 %v339_v52  ;;  %819 = vmatprep.subr.mxu1 %v474_v60 }
  0x89   : > { %448 = vmatmul.mubr.f32.vlgmr.msra.gmra.mxu0 %v338_v54  ;;  %845 = vmatprep.subr.mxu0 %v1151_v0 }
  0x8a   : > { %820 = vmatpush3.msra.mxu1 %v458_v61  ;;  %846 = vmatpush3.msra.mxu0 %v581_v3 }
  0x8b   : > { %821 = vmatprep.subr.mxu1 %v473_v62  ;;  %847 = vmatprep.subr.mxu0 %v1151_v0 }
  0x8c   : > { %822 = vmatpush3.msra.mxu1 %v457_v63  ;;  %848 = vmatpush3.msra.mxu0 %v580_v4 }
  0x8d   : > { %823 = vmatprep.subr.mxu1 %v472_v1  ;;  %849 = vmatprep.subr.mxu0 %v1151_v0 }
  0x8e   : > { %824 = vmatpush3.msra.mxu1 %v456_v2  ;;  %850 = vmatpush3.msra.mxu0 %v579_v5 }
  0x8f   : > { %851 = vmatprep.subr.mxu0 %v1151_v0  ;;  %877 = vmatprep.mubr.msk.f32.mxu0 %vm1152_vm0, %v1151_v0 }
  0x90   : > { %852 = vmatpush3.msra.mxu0 %v578_v6 }
  0x91   : > { %853 = vmatprep.subr.mxu0 %v1151_v0 }
  0x92   : > { %854 = vmatpush3.msra.mxu0 %v577_v7 }
  0x93   : > { %855 = vmatprep.subr.mxu0 %v1151_v0 }
  0x94   : > { %856 = vmatpush3.msra.mxu0 %v576_v8 }
  0x95   : > { %857 = vmatprep.subr.mxu0 %v1151_v0 }
  0x96   : > { %858 = vmatpush3.msra.mxu0 %v575_v9 }
  0x97   : > { %859 = vmatprep.subr.mxu0 %v1151_v0 }
  0x98   : > { %860 = vmatpush3.msra.mxu0 %v574_v10 }
  0x99   : > { %861 = vmatprep.subr.mxu0 %v1151_v0 }
  0x9a   : > { %862 = vmatpush3.msra.mxu0 %v573_v11 }
  0x9b   : > { %863 = vmatprep.subr.mxu0 %v1151_v0 }
  0x9c   : > { %864 = vmatpush3.msra.mxu0 %v572_v12 }
  0x9d   : > { %865 = vmatprep.subr.mxu0 %v1151_v0 }
  0x9e   : > { %866 = vmatpush3.msra.mxu0 %v571_v13 }
  0x9f   : > { %867 = vmatprep.subr.mxu0 %v1151_v0 }
  0xa0   : > { %868 = vmatpush3.msra.mxu0 %v570_v27 }
  0xa1   : > { %869 = vmatprep.subr.mxu0 %v1151_v0 }
  0xa2   : > { %870 = vmatpush3.msra.mxu0 %v569_v28 }
  0xa3   : > { %871 = vmatprep.subr.mxu0 %v1151_v0 }
  0xa4   : > { %872 = vmatpush3.msra.mxu0 %v568_v29 }
  0xa5   : > { %873 = vmatprep.subr.mxu0 %v1151_v0 }
  0xa6   : > { %874 = vmatpush3.msra.mxu0 %v567_v30 }
  0xa7   : > { %875 = vmatprep.subr.mxu0 %v1151_v0 }
  0xa8   : > { %876 = vmatpush3.msra.mxu0 %v566_v31 }
 0x149   : > { %v449_v21 = vpop.f32.mrf.mxu0 }
 0x14a   : > { %v450_v22 = vadd.f32 %v449_v21, %v376_v19 }
 0x14b   : > { %v451_v23 = vpop.f32.mrf.mxu0 }
 0x14c   : > { %v452_v24 = vadd.f32 %v451_v23, %v380_v20  ;;  %v454_v26 = vmax.f32 %v450_v22, 0.0 }
 0x14e   : > { %v455_v25 = vmax.f32 %v452_v24, 0.0 }
 0x150   : > { %559 = vmatprep.mubr.f32.mxu1 %v455_v25 }
 0x151   : > { %560 = vmatmul.mubr.f32.vlgmr.msra.gmra.mxu1 %v454_v26 }
 0x211   : > { %v825_v32 = vpop.f32.mrf.mxu1 }
 0x213   : > { %v826_v34 = vpop.f32.mrf.mxu1 }
 0x214   : > { %v827_v35 = vadd.f32 %v826_v34, %v825_v32 }
 0x216   : > { %v562_v36 = vadd.f32 %v827_v35, %v787_v33 }
 0x218   : > { %v565_v37 = vmax.f32 %v562_v36, 0.0 }
 0x21a   : > { %878 = vmatmul.mubr.f32.vlgmr.msra.gmra.mxu0 %v565_v37 }
 0x2da   : > { %v655_v0 = vpop.f32.mrf.mxu0 }
 0x2db   : > { %v656_v39 = vadd.f32 %v788_v38, %v655_v0 }
 0x2dc   : > { %v879_v40 = vpop.f32.mrf.mxu0 }
 0x2dd   : > { %659 = vst [vmem:[%s337_s10] sm:$0xff] %v656_v39 }
 0x2de   : > { %1082 = shalt.err (!%p1079_p9)
}
 0x2df   : > { %s1083_s9 = scalar_lea.hbm %s1373_s20, 128  ;;  %s1087_s11 = scalar_lea.hbm %s1416_s7, 512 }
 0x2e0   : > { %p1084_p12 = scmp.ne.s32.totalorder %s1373_s20, %s1083_s9  ;;  %p1088_p6 = scmp.lt.s32.totalorder %s1373_s20, %s1416_s7 }
 0x2e1   : > { %p1089_p10 = scmp.lt.s32.totalorder %s1087_s11, %s1083_s9 }
 0x2e2   : > { %p1085_p4 = pnand %p1084_p12, %p1438_p13 }
 0x2e3   : > { %p1090_p7 = por %p1089_p10, %p1088_p6 }
 0x2e4   : > { %p1086_p8 = pneg %p1085_p4 }
 0x2e6   : > { %p1091_p11 = pnand %p1090_p7, %p1086_p8 }
 0x2e8   : > { %1094 = shalt.err (!%p1091_p11)
}
 0x2e9   : > { %894 = dma.vmem_to_hbm [thread:$0]  (%p1438_p13), %s675_s15, 128, %s1373_s20, %s661_s1  }
 0x2ea PF: > { %p921_p3 = scmp.ge.s32.totalorder %s1141_s27, 2  ;;  %s686_s23 = sand.u32 1, %s1129_s24  }
 0x2eb   : > { %p1439_p0 = scmp.ne.s32.totalorder %s1424_s8, 0  ;;  %s687_s10 = scalar_lea.sflag [#allocation4], %s686_s23 }
 0x2ed   : > { %p911_p1 = pnand %p921_p3, %p1439_p0 }
 0x2ef   : > { %p912_p2 = pneg %p911_p1 }
 0x2f1   : > { %1124 = dma.done.wait (%p912_p2), %s687_s10, 128  }
 0x2f2   : > { %1126 = vsyncadd (%p912_p2), %s687_s10, 4294967168  ;;  %p22_p5 = scmp.ge.s32.totalorder %s1265_s13, 6   ;;  %s1440_s24 = smov %s1133_s25 }
 0x2f3   : > { %s1441_s25 = smov %s1137_s26  ;;  %s1442_s26 = smov %s1283_s12 }
 0x2f4   : > { %s1443_s27 = smov %s1265_s13  ;;  %24 = sbr.rel (!%p22_p5) target bundleno = 10 (0xa), region = 105 }
 0x2f9   :  { %692 = vsyncpa [#allocation3], 1 }
 0x2fa   :  { %694 = vsyncpa [#allocation3 + $0x1], 1 }
 0x2fb   :  { %695 = vsyncpa [#allocation6], 1 }
 0x2fc   :  { %696 = vsyncpa [#allocation9], 1 }
 0x2fd   :  { %697 = vsyncpa [#allocation4], 1 }
 0x2fe   :  { %699 = vsyncpa [#allocation4 + $0x1], 1 }

</bundles_post_ra>
